<compile_context>
chip_gen: v6e
topology: v6e:2x2x1
jax: 0.10.0
libtpu: 0.0.40
codegen_flags: <defaults>
</compile_context>

<pallas_src>
import jax
import jax.numpy as jnp
from jax.experimental import pallas as pl
from jax.experimental.pallas import tpu as pltpu

IN_FEATURES = 3 * 32 * 32   # 3072
HIDDEN = 120
HIDDEN_PAD = 128            # pad hidden dim to a full 128-lane vreg width
OUT = 10
OUT_PAD = 128               # lane-dense output block; wrapper slices [:, :10]
TM_MAX = 1024               # per-step batch-tile rows (amortizes ~0.35us/step)


def _round_up(a, m):
    return (a + m - 1) // m * m


def net_kernel(x_ref, w1_ref, b1_ref, w2_ref, b2_ref, o_ref):
    # fc1: cast the f32 activation tile to bf16 in-kernel (VPU, hidden under
    # the x DMA) and accumulate in f32 on the MXU.
    x_bf16 = x_ref[...].astype(jnp.bfloat16)
    h = jnp.dot(x_bf16, w1_ref[...], preferred_element_type=jnp.float32)
    h = jnp.maximum(h + b1_ref[...], 0.0)              # (tm, 128) + (1, 128)
    # fc2: small bf16 matmul (f32 accumulation); padded rows/cols are zero.
    y = jnp.dot(h.astype(jnp.bfloat16), w2_ref[...],
                preferred_element_type=jnp.float32)
    o_ref[...] = (y + b2_ref[...]).astype(o_ref.dtype)


def net_forward(x, w1, b1, w2, b2):
    """x: (B, 3, 32, 32) float32 -> (B, 10) float32."""
    B = x.shape[0]
    x2d = x.reshape(B, IN_FEATURES)          # stays f32: single HBM pass over x

    # Batch tile: at least 2 grid steps whenever B > 8 (keeps both v7x TCs
    # busy), capped at TM_MAX; for tiny batches use the full batch as one
    # sublane-exact block (no partial blocks in that case).
    if B <= 8:
        tm = B
    else:
        tm = min(TM_MAX, max(8, _round_up(pl.cdiv(B, 2), 8)))
    grid = (pl.cdiv(B, tm),)                 # partial tail block handled by Pallas

    # --- wrapper-side weight layout prep (tiny, one-off) -------------------
    # Weights stored as (in_features, out_features) == PyTorch weight.T.
    w1p = jnp.pad(w1, ((0, 0), (0, HIDDEN_PAD - HIDDEN))).astype(jnp.bfloat16)
    b1p = jnp.pad(b1, (0, HIDDEN_PAD - HIDDEN)).reshape(1, HIDDEN_PAD)
    w2p = jnp.pad(w2, ((0, HIDDEN_PAD - HIDDEN),
                       (0, OUT_PAD - OUT))).astype(jnp.bfloat16)
    b2p = jnp.pad(b2, (0, OUT_PAD - OUT)).reshape(1, OUT_PAD)

    # --- VMEM budget from the actual tile dtypes, with headroom -------------
    x_bytes = x2d.dtype.itemsize             # 4 (f32 input tiles)
    vmem_bytes = (
        2 * tm * IN_FEATURES * x_bytes       # double-buffered f32 x tiles
        + tm * IN_FEATURES * 2               # in-kernel bf16 copy of the x tile
        + 2 * IN_FEATURES * HIDDEN_PAD * 2   # w1 (resident, double-buffered bf16)
        + 2 * tm * OUT_PAD * 4               # double-buffered f32 output tiles
        + tm * HIDDEN_PAD * (4 + 2)          # h intermediate (f32 + bf16 copy)
        + 2 * (HIDDEN_PAD * OUT_PAD * 2 + HIDDEN_PAD * 4 + OUT_PAD * 4)
    )
    vmem_limit = min(52 << 20, max(16 << 20, int(vmem_bytes * 1.4)))

    out = pl.pallas_call(
        net_kernel,
        out_shape=jax.ShapeDtypeStruct((B, OUT_PAD), jnp.float32),
        grid=grid,
        in_specs=[
            pl.BlockSpec((tm, IN_FEATURES), lambda i: (i, 0)),          # x: streamed
            pl.BlockSpec((IN_FEATURES, HIDDEN_PAD), lambda i: (0, 0)),  # w1: resident
            pl.BlockSpec((1, HIDDEN_PAD), lambda i: (0, 0)),            # b1: resident
            pl.BlockSpec((HIDDEN_PAD, OUT_PAD), lambda i: (0, 0)),      # w2: resident
            pl.BlockSpec((1, OUT_PAD), lambda i: (0, 0)),               # b2: resident
        ],
        out_specs=pl.BlockSpec((tm, OUT_PAD), lambda i: (i, 0)),
        compiler_params=pltpu.CompilerParams(
            dimension_semantics=("parallel",),
            vmem_limit_bytes=vmem_limit,
        ),
    )(x2d, w1p, b1p, w2p, b2p)

    return out[:, :OUT]


def init_params(key):
    """Deterministic init mimicking nn.Linear's uniform(-1/sqrt(fan_in), +)."""
    k1, k2, k3, k4 = jax.random.split(key, 4)
    lim1 = 1.0 / jnp.sqrt(jnp.float32(IN_FEATURES))
    lim2 = 1.0 / jnp.sqrt(jnp.float32(HIDDEN))
    # Stored as (in_features, out_features) == PyTorch weight.T
    w1 = jax.random.uniform(k1, (IN_FEATURES, HIDDEN), jnp.float32, -lim1, lim1)
    b1 = jax.random.uniform(k2, (HIDDEN,), jnp.float32, -lim1, lim1)
    w2 = jax.random.uniform(k3, (HIDDEN, OUT), jnp.float32, -lim2, lim2)
    b2 = jax.random.uniform(k4, (OUT,), jnp.float32, -lim2, lim2)
    return w1, b1, w2, b2


if __name__ == "__main__":
    key = jax.random.PRNGKey(0)
    kx, kp = jax.random.split(key)
    B = 2
    x = jax.random.normal(kx, (B, 3, 32, 32), jnp.float32)
    w1, b1, w2, b2 = init_params(kp)

    out = net_forward(x, w1, b1, w2, b2)
    jax.block_until_ready(out)
    assert out.shape == (B, OUT)

    x2d = x.reshape(B, -1)
    # Reference along the same precision path (bf16 MXU inputs, f32 accumulate,
    # f32 bias adds) -- should match the kernel tightly.
    h_ref = jnp.maximum(
        jnp.dot(x2d.astype(jnp.bfloat16), w1.astype(jnp.bfloat16),
                preferred_element_type=jnp.float32) + b1, 0.0)
    y_ref = jnp.dot(h_ref.astype(jnp.bfloat16), w2.astype(jnp.bfloat16),
                    preferred_element_type=jnp.float32) + b2
    assert jnp.allclose(out, y_ref, atol=2e-3, rtol=2e-3)

    # Full-f32 reference (module semantics); the bf16 MXU path is a small,
    # deliberate precision tradeoff -> looser tolerance.
    ref_f32 = jnp.maximum(x2d @ w1 + b1, 0.0) @ w2 + b2
    assert jnp.allclose(out, ref_f32, atol=5e-2, rtol=5e-2)

    print("KERNEL_OK")
</pallas_src>

<mosaic_0001>
module attributes {stable_mosaic.version = 11 : i64} {
  func.func @net_kernel(%arg0: i32, %arg1: memref<2x3072xf32, #tpu.memory_space<vmem>>, %arg2: memref<3072x128xbf16, #tpu.memory_space<vmem>>, %arg3: memref<1x128xf32, #tpu.memory_space<vmem>>, %arg4: memref<128x128xbf16, #tpu.memory_space<vmem>>, %arg5: memref<1x128xf32, #tpu.memory_space<vmem>>, %arg6: memref<2x128xf32, #tpu.memory_space<vmem>>) attributes {dimension_semantics = [#tpu.dimension_semantics<parallel>], iteration_bounds = array<i64: 1>, scalar_prefetch = 0 : i64, scratch_operands = 0 : i64, tpu.core_type = #tpu.core_type<tc>, window_params = [{transform_indices = @transform_0, window_bounds = array<i64: 2, 3072>}, {pipeline_mode = #tpu.pipeline_mode<synchronous>, transform_indices = @transform_1, window_bounds = array<i64: 3072, 128>}, {pipeline_mode = #tpu.pipeline_mode<synchronous>, transform_indices = @transform_2, window_bounds = array<i64: 1, 128>}, {pipeline_mode = #tpu.pipeline_mode<synchronous>, transform_indices = @transform_3, window_bounds = array<i64: 128, 128>}, {pipeline_mode = #tpu.pipeline_mode<synchronous>, transform_indices = @transform_4, window_bounds = array<i64: 1, 128>}, {transform_indices = @transform_5, window_bounds = array<i64: 2, 128>}]} {
    %c0 = arith.constant 0 : index
    %c0_0 = arith.constant 0 : index
    %0 = vector.load %arg1[%c0, %c0_0] : memref<2x3072xf32, #tpu.memory_space<vmem>>, vector<2x3072xf32>
    %1 = arith.truncf %0 : vector<2x3072xf32> to vector<2x3072xbf16>
    %c0_1 = arith.constant 0 : index
    %c0_2 = arith.constant 0 : index
    %2 = vector.load %arg2[%c0_1, %c0_2] : memref<3072x128xbf16, #tpu.memory_space<vmem>>, vector<3072x128xbf16>
    %cst = arith.constant dense<0.000000e+00> : vector<2x128xf32>
    %3 = tpu.matmul %1, %2, %cst {dimension_numbers = #tpu.dot_dimension_numbers<[1], [0], [0], [1], [0, 0, 1, 1], [], []>} : vector<2x3072xbf16>, vector<3072x128xbf16>, vector<2x128xf32> -> vector<2x128xf32>
    %c0_3 = arith.constant 0 : index
    %c0_4 = arith.constant 0 : index
    %4 = vector.load %arg3[%c0_3, %c0_4] : memref<1x128xf32, #tpu.memory_space<vmem>>, vector<1x128xf32>
    %5 = vector.broadcast %4 : vector<1x128xf32> to vector<2x128xf32>
    %6 = arith.addf %3, %5 : vector<2x128xf32>
    %cst_5 = arith.constant 0.000000e+00 : f32
    %7 = vector.broadcast %cst_5 : f32 to vector<2x128xf32>
    %8 = arith.maximumf %6, %7 : vector<2x128xf32>
    %9 = arith.truncf %8 : vector<2x128xf32> to vector<2x128xbf16>
    %c0_6 = arith.constant 0 : index
    %c0_7 = arith.constant 0 : index
    %10 = vector.load %arg4[%c0_6, %c0_7] : memref<128x128xbf16, #tpu.memory_space<vmem>>, vector<128x128xbf16>
    %cst_8 = arith.constant dense<0.000000e+00> : vector<2x128xf32>
    %11 = tpu.matmul %9, %10, %cst_8 {dimension_numbers = #tpu.dot_dimension_numbers<[1], [0], [0], [1], [0, 0, 1, 1], [], []>} : vector<2x128xbf16>, vector<128x128xbf16>, vector<2x128xf32> -> vector<2x128xf32>
    %c0_9 = arith.constant 0 : index
    %c0_10 = arith.constant 0 : index
    %12 = vector.load %arg5[%c0_9, %c0_10] : memref<1x128xf32, #tpu.memory_space<vmem>>, vector<1x128xf32>
    %13 = vector.broadcast %12 : vector<1x128xf32> to vector<2x128xf32>
    %14 = arith.addf %11, %13 : vector<2x128xf32>
    %c0_11 = arith.constant 0 : index
    %c0_12 = arith.constant 0 : index
    %15 = vector.load %arg6[%c0_11, %c0_12] : memref<2x128xf32, #tpu.memory_space<vmem>>, vector<2x128xf32>
    tpu.vector_store %arg6[%c0_11, %c0_12], %14 {strides = array<i32>} : memref<2x128xf32, #tpu.memory_space<vmem>>, vector<2x128xf32>,
    return
  }
  func.func @transform_0(%arg0: i32) -> (i32, i32) {
    %c0_i32 = arith.constant 0 : i32
    %c0_i32_0 = arith.constant 0 : i32
    return %arg0, %c0_i32 : i32, i32
  }
  func.func @transform_1(%arg0: i32) -> (i32, i32) {
    %c0_i32 = arith.constant 0 : i32
    %c0_i32_0 = arith.constant 0 : i32
    %c0_i32_1 = arith.constant 0 : i32
    return %c0_i32, %c0_i32_0 : i32, i32
  }
  func.func @transform_2(%arg0: i32) -> (i32, i32) {
    %c0_i32 = arith.constant 0 : i32
    %c0_i32_0 = arith.constant 0 : i32
    %c0_i32_1 = arith.constant 0 : i32
    return %c0_i32, %c0_i32_0 : i32, i32
  }
  func.func @transform_3(%arg0: i32) -> (i32, i32) {
    %c0_i32 = arith.constant 0 : i32
    %c0_i32_0 = arith.constant 0 : i32
    %c0_i32_1 = arith.constant 0 : i32
    return %c0_i32, %c0_i32_0 : i32, i32
  }
  func.func @transform_4(%arg0: i32) -> (i32, i32) {
    %c0_i32 = arith.constant 0 : i32
    %c0_i32_0 = arith.constant 0 : i32
    %c0_i32_1 = arith.constant 0 : i32
    return %c0_i32, %c0_i32_0 : i32, i32
  }
  func.func @transform_5(%arg0: i32) -> (i32, i32) {
    %c0_i32 = arith.constant 0 : i32
    %c0_i32_0 = arith.constant 0 : i32
    return %arg0, %c0_i32 : i32, i32
  }
}

</mosaic_0001>

<bundles_post_ra>
// kernel: tpu_custom_call.1
= control target key start
LH: loop header
LB: loop body
LE: loop exit
PB: predicated region body
PF: predicated region fallthrough
CT: control target
= control target key end

     0   :  { %10 = vsyncpa [#allocation3], 0  ;;  %s3243_s0 = inlined_call_operand.hbm [shape: f32[2,3072], index: 0, kind: input, shape index: {}]   ;;  %s3244_s1 = inlined_call_operand.hbm [shape: bf16[3072,128], index: 1, kind: input, shape index: {}]   ;;  %s3245_s2 = inlined_call_operand.vmem [shape: f32[1,128], index: 2, kind: input, shape index: {}]   ;;  %s3246_s3 = inlined_call_operand.hbm [shape: bf16[128,128], index: 3, kind: input, shape index: {}]   ;;  %s3247_s4 = inlined_call_operand.vmem [shape: f32[1,128], index: 4, kind: input, shape index: {}]   ;;  %s3248_s5 = inlined_call_operand.hbm [shape: f32[2,128], index: 5, kind: output, shape index: {}]  }
   0x1   :  { %11 = vsyncpa [#allocation6], 0 }
   0x2   :  { %12 = vsyncpa [#allocation4], 0  ;;  %s3172_s18 = smov [#allocation5]  }
   0x3   :  { %s28_s19 = sshll.u32 %s3172_s18, 4  ;;  %s29_s19 = int_to_ptr.vmem [resolvable:$true] %s28_s19 }
   0x4   :  { %s3094_s20 = scalar_lea.vmem %s29_s19, 24576  ;;  %p3099_p1 = scmp.lt.s32.totalorder %s29_s19, %s29_s19 }
   0x5   :  { %p3095_p0 = scmp.ne.s32.totalorder %s29_s19, %s3094_s20  ;;  %p3100_p2 = scmp.lt.s32.totalorder %s3094_s20, %s3094_s20 }
   0x7   :  { %p3101_p3 = por %p3100_p2, %p3099_p1 }
   0x9   :  { %p3102_p4 = pnand %p3101_p3, %p3095_p0 }
   0xb   :  { %3105 = shalt.err (!%p3102_p4)
}
   0xc   :  { %s3173_s21 = smov 64   ;;  %s3174_s22 = smov 4  }
   0xd   :  { %34 = dma.hbm_to_vmem [thread:$0]  %s3244_s1, 24576, %s29_s19, [#allocation6], %s3173_s21, %s3173_s21, %s3174_s22  }
   0xe   :  { %s3175_s25 = smov [#allocation2]   ;;  %s3176_s27 = smov [#allocation7]  }
   0xf   :  { %s19_s26 = sshll.u32 %s3175_s25, 4  ;;  %s42_s28 = sshll.u32 %s3176_s27, 4  ;;  %s20_s26 = int_to_ptr.vmem [resolvable:$true] %s19_s26  ;;  %s43_s28 = int_to_ptr.vmem [resolvable:$true] %s42_s28 }
  0x10   :  { %s3114_s29 = scalar_lea.vmem %s20_s26, 768  ;;  %p3119_p6 = scmp.lt.s32.totalorder %s20_s26, %s20_s26 }
  0x11   :  { %p3115_p5 = scmp.ne.s32.totalorder %s20_s26, %s3114_s29  ;;  %p3120_p7 = scmp.lt.s32.totalorder %s3114_s29, %s3114_s29 }
  0x13   :  { %p3121_p8 = por %p3120_p7, %p3119_p6 }
  0x15   :  { %p3122_p9 = pnand %p3121_p8, %p3115_p5 }
  0x17   :  { %3125 = shalt.err (!%p3122_p9)
}
  0x18   :  { %22 = dma.hbm_to_vmem [thread:$0]  %s3243_s0, 768, %s20_s26, [#allocation3]  }
  0x19   :  { %s3134_s7 = scalar_lea.vmem %s43_s28, 1024  ;;  %p3139_p11 = scmp.lt.s32.totalorder %s43_s28, %s43_s28 }
  0x1a   :  { %p3135_p10 = scmp.ne.s32.totalorder %s43_s28, %s3134_s7  ;;  %p3140_p12 = scmp.lt.s32.totalorder %s3134_s7, %s3134_s7 }
  0x1c   :  { %p3141_p13 = por %p3140_p12, %p3139_p11 }
  0x1e   :  { %p3142_p0 = pnand %p3141_p13, %p3135_p10 }
  0x20   :  { %3145 = shalt.err (!%p3142_p0)
}
  0x21   :  { %48 = dma.hbm_to_vmem [thread:$0]  %s3246_s3, 1024, %s43_s28, [#allocation6], %s3173_s21, %s3173_s21, %s3174_s22  }
  0x22   :  { %3166 = dma.done.wait [#allocation3], 768  }
  0x23   :  { %3167 = vsyncadd [#allocation3], 4294966528 }
  0x24   :  { %3168 = dma.done.wait [#allocation6], 25600  }
  0x25   :  { %3169 = vsyncadd [#allocation6], 4294941696  ;;  %v2880_v0 = vld [vmem:[#allocation5 + $0x78] sm:$0xff]   ;;  %v2884_v4 = vld [vmem:[#allocation5 + $0x70] sm:$0xff]   ;;  %v3177_v22 = vmov 1983009808   ;;  %v77_v24 = vlaneseq }
  0x26   :  { %v2881_v1 = vld [vmem:[#allocation5 + $0xf8] sm:$0xff]   ;;  %2578 = vmatprep.subr.bf16.mxu0 %v2880_v0  ;;  %v2885_v5 = vld [vmem:[#allocation5 + $0xf0] sm:$0xff]   ;;  %v2888_v8 = vld [vmem:[#allocation5 + $0x68] sm:$0xff]   ;;  %v75_v23 = vunpack.c.l.s4 %v3177_v22  ;;  %vm3179_vm0 = vmmov 0   ;;  %s3180_s10 = smov [#allocation8]  }
  0x27   :  { %v2882_v2 = vld [vmem:[#allocation5 + $0x38] sm:$0xff]   ;;  %2600 = vmatprep.subr.bf16.mxu1 %v2881_v1  ;;  %v2886_v6 = vld [vmem:[#allocation5 + $0x30] sm:$0xff]   ;;  %v2889_v9 = vld [vmem:[#allocation5 + $0xe8] sm:$0xff]   ;;  %v78_v30 = vshrl.u32 %v77_v24, 7  ;;  %s2366_s11 = sshll.u32 %s3180_s10, 4  ;;  %s2367_s11 = int_to_ptr.vmem [resolvable:$true] %s2366_s11 }
  0x28   :  { %v2883_v3 = vld [vmem:[#allocation5 + $0xb8] sm:$0xff]   ;;  %2579 = vmatpush3.bf16.msra.mxu0 %v2882_v2  ;;  %v2887_v7 = vld [vmem:[#allocation5 + $0xb0] sm:$0xff]   ;;  %v2890_v10 = vld [vmem:[#allocation5 + $0x28] sm:$0xff]   ;;  %v76_v29 = vunpack.c.0.s8 %v75_v23  ;;  %s3146_s12 = scalar_lea.vmem %s2367_s11, 32  ;;  %p3151_p2 = scmp.lt.s32.totalorder %s2367_s11, %s2367_s11 }
  0x29   :  { %2601 = vmatpush3.bf16.msra.mxu1 %v2883_v3  ;;  %2580 = vmatprep.subr.bf16.mxu0 %v2884_v4  ;;  %v2891_v11 = vld [vmem:[#allocation5 + $0xa8] sm:$0xff]   ;;  %v2892_v12 = vld [vmem:[#allocation5 + $0x60] sm:$0xff]   ;;  %v2896_v16 = vld [vmem:[#allocation5 + $0x58] sm:$0xff]   ;;  %p3147_p1 = scmp.ne.s32.totalorder %s2367_s11, %s3146_s12  ;;  %p3152_p3 = scmp.lt.s32.totalorder %s3146_s12, %s3146_s12 }
  0x2a   :  { %2602 = vmatprep.subr.bf16.mxu1 %v2885_v5  ;;  %v2893_v13 = vld [vmem:[#allocation5 + $0xe0] sm:$0xff]   ;;  %v2897_v17 = vld [vmem:[#allocation5 + $0xd8] sm:$0xff]   ;;  %v2900_v20 = vld [vmem:[#allocation5 + $0x50] sm:$0xff]   ;;  %v3220_v35 = vsub.s32 %v76_v29, %v78_v30 }
  0x2b   :  { %v2894_v14 = vld [vmem:[#allocation5 + $0x20] sm:$0xff]   ;;  %v2898_v18 = vld [vmem:[#allocation5 + $0x18] sm:$0xff]   ;;  %v2901_v21 = vld [vmem:[#allocation5 + $0xd0] sm:$0xff]   ;;  %p3153_p4 = por %p3152_p3, %p3151_p2 }
  0x2c   :  { %2581 = vmatpush3.bf16.msra.mxu0 %v2886_v6  ;;  %v2895_v15 = vld [vmem:[#allocation5 + $0xa0] sm:$0xff]   ;;  %v2899_v19 = vld [vmem:[#allocation5 + $0x98] sm:$0xff]   ;;  %v2902_v25 = vld [vmem:[#allocation5 + $0x10] sm:$0xff]  }
  0x2d   :  { %2603 = vmatpush3.bf16.msra.mxu1 %v2887_v7  ;;  %2582 = vmatprep.subr.bf16.mxu0 %v2888_v8  ;;  %v2903_v26 = vld [vmem:[#allocation5 + $0x90] sm:$0xff]   ;;  %v2904_v27 = vld [vmem:[#allocation5 + $0x48] sm:$0xff]   ;;  %v2908_v33 = vld [vmem:[#allocation5 + $0x40] sm:$0xff]   ;;  %p3154_p5 = pnand %p3153_p4, %p3147_p1 }
  0x2e   :  { %2604 = vmatprep.subr.bf16.mxu1 %v2889_v9  ;;  %v2905_v28 = vld [vmem:[#allocation5 + $0xc8] sm:$0xff]   ;;  %v2909_v34 = vld [vmem:[#allocation5 + $0xc0] sm:$0xff]   ;;  %v61_v38 = vld [vmem:[#allocation2] sm:$0xff] }
  0x2f   :  { %v2906_v31 = vld [vmem:[#allocation5 + $0x8] sm:$0xff]   ;;  %v2910_v36 = vld [vmem:[#allocation5] sm:$0xff]   ;;  %v80_v39 = vrot.slane %v61_v38, %v3220_v35  ;;  %v73_v40 = vcombine.high %v61_v38, %v61_v38  ;;  %v2913_v41 = vld [vmem:[#allocation5 + $0x178] sm:$0xff]  }
  0x30   :  { %2583 = vmatpush3.bf16.msra.mxu0 %v2890_v10  ;;  %v2907_v32 = vld [vmem:[#allocation5 + $0x88] sm:$0xff]   ;;  %v2911_v37 = vld [vmem:[#allocation5 + $0x80] sm:$0xff]   ;;  %v2914_v42 = vld [vmem:[#allocation5 + $0x1f8] sm:$0xff]  }
  0x31   :  { %2605 = vmatpush3.bf16.msra.mxu1 %v2891_v11  ;;  %2584 = vmatprep.subr.bf16.mxu0 %v2892_v12  ;;  %v88_v43 = vcombine.high %v80_v39, %v80_v39  ;;  %v87_v44 = vrot.slane %v73_v40, %v3220_v35  ;;  %v199_v45 = vpack.c.bf16 %v80_v39, %v80_v39  ;;  %v2915_v46 = vld [vmem:[#allocation5 + $0x138] sm:$0xff]   ;;  %v2917_v51 = vld [vmem:[#allocation5 + $0x170] sm:$0xff]   ;;  %v2921_v56 = vld [vmem:[#allocation5 + $0x168] sm:$0xff]  }
  0x32   :  { %2606 = vmatprep.subr.bf16.mxu1 %v2893_v13  ;;  %v2916_v49 = vld [vmem:[#allocation5 + $0x1b8] sm:$0xff]   ;;  %v2918_v53 = vld [vmem:[#allocation5 + $0x1f0] sm:$0xff]   ;;  %v2922_v57 = vld [vmem:[#allocation5 + $0x1e8] sm:$0xff]  }
  0x33   :  { %v200_v47 = vpack.c.bf16 %v88_v43, %v88_v43  ;;  %v89_v48 = vcombine.high %v87_v44, %v87_v44  ;;  %v201_v50 = vpack.c.bf16 %v87_v44, %v87_v44  ;;  %v2919_v54 = vld [vmem:[#allocation5 + $0x130] sm:$0xff]   ;;  %v2923_v58 = vld [vmem:[#allocation5 + $0x128] sm:$0xff]   ;;  %v2925_v60 = vld [vmem:[#allocation5 + $0x160] sm:$0xff]  }
  0x34   :  { %2585 = vmatpush3.bf16.msra.mxu0 %v2894_v14  ;;  %v2920_v55 = vld [vmem:[#allocation5 + $0x1b0] sm:$0xff]   ;;  %v2924_v59 = vld [vmem:[#allocation5 + $0x1a8] sm:$0xff]   ;;  %v2926_v61 = vld [vmem:[#allocation5 + $0x1e0] sm:$0xff]  }
  0x35   :  { %2607 = vmatpush3.bf16.msra.mxu1 %v2895_v15  ;;  %2586 = vmatprep.subr.bf16.mxu0 %v2896_v16  ;;  %v202_v52 = vpack.c.bf16 %v89_v48, %v89_v48  ;;  %v2927_v62 = vld [vmem:[#allocation5 + $0x120] sm:$0xff]   ;;  %v2929_v0 = vld [vmem:[#allocation5 + $0x158] sm:$0xff]   ;;  %v2933_v4 = vld [vmem:[#allocation5 + $0x150] sm:$0xff]  }
  0x36   :  { %2608 = vmatprep.subr.bf16.mxu1 %v2897_v17  ;;  %1798 = vmatprep.mubr.bf16.mxu0 %v200_v47  ;;  %v2928_v63 = vld [vmem:[#allocation5 + $0x1a0] sm:$0xff]   ;;  %v2930_v1 = vld [vmem:[#allocation5 + $0x1d8] sm:$0xff]   ;;  %v2934_v5 = vld [vmem:[#allocation5 + $0x1d0] sm:$0xff]  }
  0x37   :  { %1838 = vmatprep.mubr.bf16.mxu1 %v202_v52  ;;  %v2931_v2 = vld [vmem:[#allocation5 + $0x118] sm:$0xff]   ;;  %v2935_v6 = vld [vmem:[#allocation5 + $0x110] sm:$0xff]   ;;  %v2937_v8 = vld [vmem:[#allocation5 + $0x148] sm:$0xff]  }
  0x38   :  { %2587 = vmatpush3.bf16.msra.mxu0 %v2898_v18  ;;  %v2932_v3 = vld [vmem:[#allocation5 + $0x198] sm:$0xff]   ;;  %v2936_v7 = vld [vmem:[#allocation5 + $0x190] sm:$0xff]   ;;  %v2938_v9 = vld [vmem:[#allocation5 + $0x1c8] sm:$0xff]  }
  0x39   :  { %2609 = vmatpush3.bf16.msra.mxu1 %v2899_v19  ;;  %2588 = vmatprep.subr.bf16.mxu0 %v2900_v20  ;;  %v2939_v10 = vld [vmem:[#allocation5 + $0x108] sm:$0xff]   ;;  %v2941_v12 = vld [vmem:[#allocation5 + $0x140] sm:$0xff]   ;;  %v62_v15 = vld [vmem:[#allocation2 + $0x8] sm:$0xff] }
  0x3a   :  { %2610 = vmatprep.subr.bf16.mxu1 %v2901_v21  ;;  %v2940_v11 = vld [vmem:[#allocation5 + $0x188] sm:$0xff]   ;;  %v2942_v13 = vld [vmem:[#allocation5 + $0x1c0] sm:$0xff]   ;;  %v97_v17 = vrot.slane %v62_v15, %v3220_v35  ;;  %v90_v18 = vcombine.high %v62_v15, %v62_v15  ;;  %v2946_v19 = vld [vmem:[#allocation5 + $0x278] sm:$0xff]  }
  0x3b   :  { %v2943_v14 = vld [vmem:[#allocation5 + $0x100] sm:$0xff]   ;;  %v2947_v22 = vld [vmem:[#allocation5 + $0x2f8] sm:$0xff]   ;;  %v2950_v29 = vld [vmem:[#allocation5 + $0x270] sm:$0xff]  }
  0x3c   :  { %2589 = vmatpush3.bf16.msra.mxu0 %v2902_v25  ;;  %v2944_v16 = vld [vmem:[#allocation5 + $0x180] sm:$0xff]   ;;  %v105_v20 = vcombine.high %v97_v17, %v97_v17  ;;  %v104_v21 = vrot.slane %v90_v18, %v3220_v35  ;;  %v203_v23 = vpack.c.bf16 %v97_v17, %v97_v17  ;;  %v2948_v24 = vld [vmem:[#allocation5 + $0x238] sm:$0xff]   ;;  %v2957_v38 = vld [vmem:[#allocation5 + $0x2a8] sm:$0xff]  }
  0x3d   :  { %2611 = vmatpush3.bf16.msra.mxu1 %v2903_v26  ;;  %2590 = vmatprep.subr.bf16.mxu0 %v2904_v27  ;;  %v2949_v27 = vld [vmem:[#allocation5 + $0x2b8] sm:$0xff]   ;;  %v2958_v39 = vld [vmem:[#allocation5 + $0x260] sm:$0xff]   ;;  %v2966_v47 = vld [vmem:[#allocation5 + $0x250] sm:$0xff]  }
  0x3e   :  { %2612 = vmatprep.subr.bf16.mxu1 %v2905_v28  ;;  %v204_v25 = vpack.c.bf16 %v105_v20, %v105_v20  ;;  %v106_v26 = vcombine.high %v104_v21, %v104_v21  ;;  %v205_v28 = vpack.c.bf16 %v104_v21, %v104_v21  ;;  %v2959_v40 = vld [vmem:[#allocation5 + $0x2e0] sm:$0xff]   ;;  %v2962_v43 = vld [vmem:[#allocation5 + $0x258] sm:$0xff]   ;;  %v2967_v48 = vld [vmem:[#allocation5 + $0x2d0] sm:$0xff]  }
  0x3f   :  { %v2963_v44 = vld [vmem:[#allocation5 + $0x2d8] sm:$0xff]   ;;  %v2971_v52 = vld [vmem:[#allocation5 + $0x2c8] sm:$0xff]   ;;  %v2991_v17 = vld [vmem:[#allocation5 + $0x360] sm:$0xff]  }
  0x40   :  { %2591 = vmatpush3.bf16.msra.mxu0 %v2906_v31  ;;  %v206_v30 = vpack.c.bf16 %v106_v26, %v106_v26  ;;  %v2951_v31 = vld [vmem:[#allocation5 + $0x2f0] sm:$0xff]   ;;  %v2989_v15 = vld [vmem:[#allocation5 + $0x328] sm:$0xff]   ;;  %v2992_v18 = vld [vmem:[#allocation5 + $0x3e0] sm:$0xff]  }
  0x41   :  { %2613 = vmatpush3.bf16.msra.mxu1 %v2907_v32  ;;  %2592 = vmatprep.subr.bf16.mxu0 %v2908_v33  ;;  %v2952_v32 = vld [vmem:[#allocation5 + $0x230] sm:$0xff]   ;;  %v2994_v20 = vld [vmem:[#allocation5 + $0x3a0] sm:$0xff]   ;;  %v2995_v21 = vld [vmem:[#allocation5 + $0x358] sm:$0xff]  }
  0x42   :  { %2614 = vmatprep.subr.bf16.mxu1 %v2909_v34  ;;  %v2953_v33 = vld [vmem:[#allocation5 + $0x2b0] sm:$0xff]   ;;  %v2954_v34 = vld [vmem:[#allocation5 + $0x268] sm:$0xff]  }
  0x43   :  { %v3000_v26 = vld [vmem:[#allocation5 + $0x3d0] sm:$0xff]  }
  0x44   :  { %2593 = vmatpush3.bf16.msra.mxu0 %v2910_v36  ;;  %v2955_v36 = vld [vmem:[#allocation5 + $0x2e8] sm:$0xff]  }
  0x45   :  { %2615 = vmatpush3.bf16.msra.mxu1 %v2911_v37  ;;  %2622 = vmatprep.subr.bf16.mxu0 %v2913_v41  ;;  %v2956_v37 = vld [vmem:[#allocation5 + $0x228] sm:$0xff]   ;;  %v2960_v41 = vld [vmem:[#allocation5 + $0x220] sm:$0xff]  }
  0x46   :  { %2644 = vmatprep.subr.bf16.mxu1 %v2914_v42  ;;  %v2961_v42 = vld [vmem:[#allocation5 + $0x2a0] sm:$0xff]  }
  0x47   :  { %1799 = vmatmul.mubr.bf16.vlgmr.msra.gmra.mxu0 %v199_v45  ;;  %v2964_v45 = vld [vmem:[#allocation5 + $0x218] sm:$0xff]  }
  0x48   :  { %2623 = vmatpush3.bf16.msra.mxu0 %v2915_v46  ;;  %1839 = vmatmul.mubr.bf16.vlgmr.msra.gmra.mxu1 %v201_v50  ;;  %v2965_v46 = vld [vmem:[#allocation5 + $0x298] sm:$0xff]   ;;  %v2969_v50 = vld [vmem:[#allocation5 + $0x290] sm:$0xff]  }
  0x49   :  { %2624 = vmatprep.subr.bf16.mxu0 %v2917_v51  ;;  %2645 = vmatpush3.bf16.msra.mxu1 %v2916_v49  ;;  %v2968_v49 = vld [vmem:[#allocation5 + $0x210] sm:$0xff]   ;;  %v2970_v51 = vld [vmem:[#allocation5 + $0x248] sm:$0xff]  }
  0x4a   :  { %2646 = vmatprep.subr.bf16.mxu1 %v2918_v53  ;;  %1878 = vmatprep.mubr.bf16.mxu0 %v204_v25  ;;  %v2972_v53 = vld [vmem:[#allocation5 + $0x208] sm:$0xff]   ;;  %v2999_v25 = vld [vmem:[#allocation5 + $0x350] sm:$0xff]  }
  0x4b   :  { %1918 = vmatprep.mubr.bf16.mxu1 %v206_v30  ;;  %v3004_v30 = vld [vmem:[#allocation5 + $0x3c8] sm:$0xff]  }
  0x4c   :  { %2625 = vmatpush3.bf16.msra.mxu0 %v2919_v54  ;;  %v2973_v54 = vld [vmem:[#allocation5 + $0x288] sm:$0xff]  }
  0x4d   :  { %2626 = vmatprep.subr.bf16.mxu0 %v2921_v56  ;;  %2647 = vmatpush3.bf16.msra.mxu1 %v2920_v55  ;;  %v2974_v55 = vld [vmem:[#allocation5 + $0x240] sm:$0xff]  }
  0x4e   :  { %2648 = vmatprep.subr.bf16.mxu1 %v2922_v57  ;;  %v2975_v56 = vld [vmem:[#allocation5 + $0x2c0] sm:$0xff]  }
  0x4f   :  { %v2976_v57 = vld [vmem:[#allocation5 + $0x200] sm:$0xff]  }
  0x50   :  { %2627 = vmatpush3.bf16.msra.mxu0 %v2923_v58  ;;  %v63_v58 = vld [vmem:[#allocation2 + $0x10] sm:$0xff] }
  0x51   :  { %2628 = vmatprep.subr.bf16.mxu0 %v2925_v60  ;;  %2649 = vmatpush3.bf16.msra.mxu1 %v2924_v59  ;;  %v2977_v59 = vld [vmem:[#allocation5 + $0x280] sm:$0xff]   ;;  %v114_v60 = vrot.slane %v63_v58, %v3220_v35 }
  0x52   :  { %2650 = vmatprep.subr.bf16.mxu1 %v2926_v61  ;;  %v107_v61 = vcombine.high %v63_v58, %v63_v58  ;;  %v3022_v58 = vld [vmem:[#allocation5 + $0x428] sm:$0xff]  }
  0x54   :  { %2629 = vmatpush3.bf16.msra.mxu0 %v2927_v62  ;;  %v2979_v62 = vld [vmem:[#allocation5 + $0x378] sm:$0xff]  }
  0x55   :  { %2630 = vmatprep.subr.bf16.mxu0 %v2929_v0  ;;  %2651 = vmatpush3.bf16.msra.mxu1 %v2928_v63  ;;  %v122_v63 = vcombine.high %v114_v60, %v114_v60  ;;  %v121_v0 = vrot.slane %v107_v61, %v3220_v35  ;;  %v3025_v61 = vld [vmem:[#allocation5 + $0x4e0] sm:$0xff]  }
  0x56   :  { %2652 = vmatprep.subr.bf16.mxu1 %v2930_v1  ;;  %v2980_v1 = vld [vmem:[#allocation5 + $0x3f8] sm:$0xff]  }
  0x58   :  { %2631 = vmatpush3.bf16.msra.mxu0 %v2931_v2  ;;  %v207_v2 = vpack.c.bf16 %v114_v60, %v114_v60  ;;  %v3024_v60 = vld [vmem:[#allocation5 + $0x460] sm:$0xff]  }
  0x59   :  { %2632 = vmatprep.subr.bf16.mxu0 %v2933_v4  ;;  %2653 = vmatpush3.bf16.msra.mxu1 %v2932_v3  ;;  %v2981_v3 = vld [vmem:[#allocation5 + $0x338] sm:$0xff]   ;;  %v208_v4 = vpack.c.bf16 %v122_v63, %v122_v63  ;;  %v3027_v63 = vld [vmem:[#allocation5 + $0x4a0] sm:$0xff]  }
  0x5a   :  { %2654 = vmatprep.subr.bf16.mxu1 %v2934_v5  ;;  %v123_v5 = vcombine.high %v121_v0, %v121_v0 }
  0x5c   :  { %2633 = vmatpush3.bf16.msra.mxu0 %v2935_v6  ;;  %v2982_v6 = vld [vmem:[#allocation5 + $0x3b8] sm:$0xff]  }
  0x5d   :  { %2634 = vmatprep.subr.bf16.mxu0 %v2937_v8  ;;  %2655 = vmatpush3.bf16.msra.mxu1 %v2936_v7  ;;  %v209_v7 = vpack.c.bf16 %v121_v0, %v121_v0  ;;  %v2983_v8 = vld [vmem:[#allocation5 + $0x370] sm:$0xff]   ;;  %v3028_v0 = vld [vmem:[#allocation5 + $0x458] sm:$0xff]  }
  0x5e   :  { %2656 = vmatprep.subr.bf16.mxu1 %v2938_v9  ;;  %v210_v9 = vpack.c.bf16 %v123_v5, %v123_v5  ;;  %v3033_v5 = vld [vmem:[#allocation5 + $0x4d0] sm:$0xff]  }
  0x60   :  { %2635 = vmatpush3.bf16.msra.mxu0 %v2939_v10  ;;  %v2984_v10 = vld [vmem:[#allocation5 + $0x3f0] sm:$0xff]  }
  0x61   :  { %2636 = vmatprep.subr.bf16.mxu0 %v2941_v12  ;;  %2657 = vmatpush3.bf16.msra.mxu1 %v2940_v11  ;;  %v2985_v11 = vld [vmem:[#allocation5 + $0x330] sm:$0xff]  }
  0x62   :  { %2658 = vmatprep.subr.bf16.mxu1 %v2942_v13  ;;  %v2986_v12 = vld [vmem:[#allocation5 + $0x3b0] sm:$0xff]   ;;  %v2987_v13 = vld [vmem:[#allocation5 + $0x368] sm:$0xff]  }
  0x64   :  { %2637 = vmatpush3.bf16.msra.mxu0 %v2943_v14  ;;  %v2988_v14 = vld [vmem:[#allocation5 + $0x3e8] sm:$0xff]  }
  0x65   :  { %2666 = vmatprep.subr.bf16.mxu0 %v2946_v19  ;;  %2659 = vmatpush3.bf16.msra.mxu1 %v2944_v16  ;;  %v2990_v16 = vld [vmem:[#allocation5 + $0x3a8] sm:$0xff]   ;;  %v2993_v19 = vld [vmem:[#allocation5 + $0x320] sm:$0xff]  }
  0x66   :  { %2688 = vmatprep.subr.bf16.mxu1 %v2947_v22  ;;  %v2996_v22 = vld [vmem:[#allocation5 + $0x3d8] sm:$0xff]  }
  0x67   :  { %1879 = vmatmul.mubr.bf16.vlgmr.msra.gmra.mxu0 %v203_v23  ;;  %v2997_v23 = vld [vmem:[#allocation5 + $0x318] sm:$0xff]  }
  0x68   :  { %2667 = vmatpush3.bf16.msra.mxu0 %v2948_v24  ;;  %1919 = vmatmul.mubr.bf16.vlgmr.msra.gmra.mxu1 %v205_v28  ;;  %v2998_v24 = vld [vmem:[#allocation5 + $0x398] sm:$0xff]   ;;  %v3002_v28 = vld [vmem:[#allocation5 + $0x390] sm:$0xff]  }
  0x69   :  { %2668 = vmatprep.subr.bf16.mxu0 %v2950_v29  ;;  %2689 = vmatpush3.bf16.msra.mxu1 %v2949_v27  ;;  %v3001_v27 = vld [vmem:[#allocation5 + $0x310] sm:$0xff]   ;;  %v3003_v29 = vld [vmem:[#allocation5 + $0x348] sm:$0xff]  }
  0x6a   :  { %2690 = vmatprep.subr.bf16.mxu1 %v2951_v31  ;;  %1958 = vmatprep.mubr.bf16.mxu0 %v208_v4  ;;  %v3005_v31 = vld [vmem:[#allocation5 + $0x308] sm:$0xff]   ;;  %v3032_v4 = vld [vmem:[#allocation5 + $0x450] sm:$0xff]  }
  0x6b   :  { %1998 = vmatprep.mubr.bf16.mxu1 %v210_v9  ;;  %v3037_v9 = vld [vmem:[#allocation5 + $0x4c8] sm:$0xff]  }
  0x6c   :  { %2669 = vmatpush3.bf16.msra.mxu0 %v2952_v32  ;;  %v3006_v32 = vld [vmem:[#allocation5 + $0x388] sm:$0xff]  }
  0x6d   :  { %2670 = vmatprep.subr.bf16.mxu0 %v2954_v34  ;;  %2691 = vmatpush3.bf16.msra.mxu1 %v2953_v33  ;;  %v3007_v33 = vld [vmem:[#allocation5 + $0x340] sm:$0xff]  }
  0x6e   :  { %2692 = vmatprep.subr.bf16.mxu1 %v2955_v36  ;;  %v3008_v34 = vld [vmem:[#allocation5 + $0x3c0] sm:$0xff]  }
  0x6f   :  { %v3009_v36 = vld [vmem:[#allocation5 + $0x300] sm:$0xff]  }
  0x70   :  { %2671 = vmatpush3.bf16.msra.mxu0 %v2956_v37  ;;  %v64_v37 = vld [vmem:[#allocation2 + $0x18] sm:$0xff] }
  0x71   :  { %2672 = vmatprep.subr.bf16.mxu0 %v2958_v39  ;;  %2693 = vmatpush3.bf16.msra.mxu1 %v2957_v38  ;;  %v131_v38 = vrot.slane %v64_v37, %v3220_v35  ;;  %v124_v39 = vcombine.high %v64_v37, %v64_v37  ;;  %v3055_v37 = vld [vmem:[#allocation5 + $0x528] sm:$0xff]  }
  0x72   :  { %2694 = vmatprep.subr.bf16.mxu1 %v2959_v40  ;;  %v3012_v40 = vld [vmem:[#allocation5 + $0x478] sm:$0xff]  }
  0x74   :  { %2673 = vmatpush3.bf16.msra.mxu0 %v2960_v41  ;;  %v3010_v41 = vld [vmem:[#allocation5 + $0x380] sm:$0xff]  }
  0x75   :  { %2674 = vmatprep.subr.bf16.mxu0 %v2962_v43  ;;  %2695 = vmatpush3.bf16.msra.mxu1 %v2961_v42  ;;  %v139_v42 = vcombine.high %v131_v38, %v131_v38  ;;  %v138_v43 = vrot.slane %v124_v39, %v3220_v35  ;;  %v3057_v39 = vld [vmem:[#allocation5 + $0x560] sm:$0xff]  }
  0x76   :  { %2696 = vmatprep.subr.bf16.mxu1 %v2963_v44  ;;  %v3013_v44 = vld [vmem:[#allocation5 + $0x4f8] sm:$0xff]  }
  0x78   :  { %2675 = vmatpush3.bf16.msra.mxu0 %v2964_v45  ;;  %v211_v45 = vpack.c.bf16 %v131_v38, %v131_v38  ;;  %v3056_v38 = vld [vmem:[#allocation5 + $0x5a8] sm:$0xff]  }
  0x79   :  { %2676 = vmatprep.subr.bf16.mxu0 %v2966_v47  ;;  %2697 = vmatpush3.bf16.msra.mxu1 %v2965_v46  ;;  %v3014_v46 = vld [vmem:[#allocation5 + $0x438] sm:$0xff]   ;;  %v212_v47 = vpack.c.bf16 %v139_v42, %v139_v42  ;;  %v3060_v42 = vld [vmem:[#allocation5 + $0x5a0] sm:$0xff]  }
  0x7a   :  { %2698 = vmatprep.subr.bf16.mxu1 %v2967_v48  ;;  %v140_v48 = vcombine.high %v138_v43, %v138_v43 }
  0x7c   :  { %2677 = vmatpush3.bf16.msra.mxu0 %v2968_v49  ;;  %v3015_v49 = vld [vmem:[#allocation5 + $0x4b8] sm:$0xff]  }
  0x7d   :  { %2678 = vmatprep.subr.bf16.mxu0 %v2970_v51  ;;  %2699 = vmatpush3.bf16.msra.mxu1 %v2969_v50  ;;  %v213_v50 = vpack.c.bf16 %v138_v43, %v138_v43  ;;  %v3016_v51 = vld [vmem:[#allocation5 + $0x470] sm:$0xff]   ;;  %v3061_v43 = vld [vmem:[#allocation5 + $0x558] sm:$0xff]  }
  0x7e   :  { %2700 = vmatprep.subr.bf16.mxu1 %v2971_v52  ;;  %v214_v52 = vpack.c.bf16 %v140_v48, %v140_v48  ;;  %v3066_v48 = vld [vmem:[#allocation5 + $0x5d0] sm:$0xff]  }
  0x80   :  { %2679 = vmatpush3.bf16.msra.mxu0 %v2972_v53  ;;  %v3017_v53 = vld [vmem:[#allocation5 + $0x4f0] sm:$0xff]  }
  0x81   :  { %2680 = vmatprep.subr.bf16.mxu0 %v2974_v55  ;;  %2701 = vmatpush3.bf16.msra.mxu1 %v2973_v54  ;;  %v3018_v54 = vld [vmem:[#allocation5 + $0x430] sm:$0xff]  }
  0x82   :  { %2702 = vmatprep.subr.bf16.mxu1 %v2975_v56  ;;  %v3019_v55 = vld [vmem:[#allocation5 + $0x4b0] sm:$0xff]   ;;  %v3020_v56 = vld [vmem:[#allocation5 + $0x468] sm:$0xff]  }
  0x84   :  { %2681 = vmatpush3.bf16.msra.mxu0 %v2976_v57  ;;  %v3021_v57 = vld [vmem:[#allocation5 + $0x4e8] sm:$0xff]  }
  0x85   :  { %2710 = vmatprep.subr.bf16.mxu0 %v2979_v62  ;;  %2703 = vmatpush3.bf16.msra.mxu1 %v2977_v59  ;;  %v3023_v59 = vld [vmem:[#allocation5 + $0x4a8] sm:$0xff]   ;;  %v3026_v62 = vld [vmem:[#allocation5 + $0x420] sm:$0xff]  }
  0x86   :  { %2732 = vmatprep.subr.bf16.mxu1 %v2980_v1  ;;  %v3029_v1 = vld [vmem:[#allocation5 + $0x4d8] sm:$0xff]  }
  0x87   :  { %1959 = vmatmul.mubr.bf16.vlgmr.msra.gmra.mxu0 %v207_v2  ;;  %v3030_v2 = vld [vmem:[#allocation5 + $0x418] sm:$0xff]  }
  0x88   :  { %2711 = vmatpush3.bf16.msra.mxu0 %v2981_v3  ;;  %1999 = vmatmul.mubr.bf16.vlgmr.msra.gmra.mxu1 %v209_v7  ;;  %v3031_v3 = vld [vmem:[#allocation5 + $0x498] sm:$0xff]   ;;  %v3035_v7 = vld [vmem:[#allocation5 + $0x490] sm:$0xff]  }
  0x89   :  { %2712 = vmatprep.subr.bf16.mxu0 %v2983_v8  ;;  %2733 = vmatpush3.bf16.msra.mxu1 %v2982_v6  ;;  %v3034_v6 = vld [vmem:[#allocation5 + $0x410] sm:$0xff]   ;;  %v3036_v8 = vld [vmem:[#allocation5 + $0x448] sm:$0xff]  }
  0x8a   :  { %2734 = vmatprep.subr.bf16.mxu1 %v2984_v10  ;;  %2038 = vmatprep.mubr.bf16.mxu0 %v212_v47  ;;  %v3038_v10 = vld [vmem:[#allocation5 + $0x408] sm:$0xff]   ;;  %v3065_v47 = vld [vmem:[#allocation5 + $0x550] sm:$0xff]  }
  0x8b   :  { %2078 = vmatprep.mubr.bf16.mxu1 %v214_v52  ;;  %v3070_v52 = vld [vmem:[#allocation5 + $0x5c8] sm:$0xff]  }
  0x8c   :  { %2713 = vmatpush3.bf16.msra.mxu0 %v2985_v11  ;;  %v3039_v11 = vld [vmem:[#allocation5 + $0x488] sm:$0xff]  }
  0x8d   :  { %2714 = vmatprep.subr.bf16.mxu0 %v2987_v13  ;;  %2735 = vmatpush3.bf16.msra.mxu1 %v2986_v12  ;;  %v3040_v12 = vld [vmem:[#allocation5 + $0x440] sm:$0xff]  }
  0x8e   :  { %2736 = vmatprep.subr.bf16.mxu1 %v2988_v14  ;;  %v3041_v13 = vld [vmem:[#allocation5 + $0x4c0] sm:$0xff]  }
  0x8f   :  { %v3042_v14 = vld [vmem:[#allocation5 + $0x400] sm:$0xff]  }
  0x90   :  { %2715 = vmatpush3.bf16.msra.mxu0 %v2989_v15  ;;  %v65_v15 = vld [vmem:[#allocation2 + $0x20] sm:$0xff] }
  0x91   :  { %2716 = vmatprep.subr.bf16.mxu0 %v2991_v17  ;;  %2737 = vmatpush3.bf16.msra.mxu1 %v2990_v16  ;;  %v3043_v16 = vld [vmem:[#allocation5 + $0x480] sm:$0xff]   ;;  %v148_v17 = vrot.slane %v65_v15, %v3220_v35 }
  0x92   :  { %2738 = vmatprep.subr.bf16.mxu1 %v2992_v18  ;;  %v141_v18 = vcombine.high %v65_v15, %v65_v15 }
  0x94   :  { %2717 = vmatpush3.bf16.msra.mxu0 %v2993_v19  ;;  %v3045_v19 = vld [vmem:[#allocation5 + $0x578] sm:$0xff]  }
  0x95   :  { %2718 = vmatprep.subr.bf16.mxu0 %v2995_v21  ;;  %2739 = vmatpush3.bf16.msra.mxu1 %v2994_v20  ;;  %v156_v20 = vcombine.high %v148_v17, %v148_v17  ;;  %v155_v21 = vrot.slane %v141_v18, %v3220_v35  ;;  %v3178_v18 = vmov 0.0  }
  0x96   :  { %2740 = vmatprep.subr.bf16.mxu1 %v2996_v22  ;;  %v3046_v22 = vld [vmem:[#allocation5 + $0x5f8] sm:$0xff]  }
  0x98   :  { %2719 = vmatpush3.bf16.msra.mxu0 %v2997_v23  ;;  %v215_v23 = vpack.c.bf16 %v148_v17, %v148_v17  ;;  %v3078_v17 = vld [vmem:[#allocation7 + $0x38] sm:$0xff]  }
  0x99   :  { %2720 = vmatprep.subr.bf16.mxu0 %v2999_v25  ;;  %2741 = vmatpush3.bf16.msra.mxu1 %v2998_v24  ;;  %v3047_v24 = vld [vmem:[#allocation5 + $0x538] sm:$0xff]   ;;  %v216_v25 = vpack.c.bf16 %v156_v20, %v156_v20  ;;  %v3080_v20 = vld [vmem:[#allocation7 + $0x28] sm:$0xff]  }
  0x9a   :  { %2742 = vmatprep.subr.bf16.mxu1 %v3000_v26  ;;  %v157_v26 = vcombine.high %v155_v21, %v155_v21 }
  0x9c   :  { %2721 = vmatpush3.bf16.msra.mxu0 %v3001_v27  ;;  %v3048_v27 = vld [vmem:[#allocation5 + $0x5b8] sm:$0xff]  }
  0x9d   :  { %2722 = vmatprep.subr.bf16.mxu0 %v3003_v29  ;;  %2743 = vmatpush3.bf16.msra.mxu1 %v3002_v28  ;;  %v217_v28 = vpack.c.bf16 %v155_v21, %v155_v21  ;;  %v3049_v29 = vld [vmem:[#allocation5 + $0x570] sm:$0xff]   ;;  %v3081_v21 = vld [vmem:[#allocation7 + $0x20] sm:$0xff]  }
  0x9e   :  { %2744 = vmatprep.subr.bf16.mxu1 %v3004_v30  ;;  %v218_v30 = vpack.c.bf16 %v157_v26, %v157_v26 }
  0xa0   :  { %2723 = vmatpush3.bf16.msra.mxu0 %v3005_v31  ;;  %v3050_v31 = vld [vmem:[#allocation5 + $0x5f0] sm:$0xff]  }
  0xa1   :  { %2724 = vmatprep.subr.bf16.mxu0 %v3007_v33  ;;  %2745 = vmatpush3.bf16.msra.mxu1 %v3006_v32  ;;  %v3051_v32 = vld [vmem:[#allocation5 + $0x530] sm:$0xff]  }
  0xa2   :  { %2746 = vmatprep.subr.bf16.mxu1 %v3008_v34  ;;  %v3052_v33 = vld [vmem:[#allocation5 + $0x5b0] sm:$0xff]   ;;  %v3053_v34 = vld [vmem:[#allocation5 + $0x568] sm:$0xff]  }
  0xa4   :  { %2725 = vmatpush3.bf16.msra.mxu0 %v3009_v36  ;;  %v3054_v36 = vld [vmem:[#allocation5 + $0x5e8] sm:$0xff]  }
  0xa5   :  { %2754 = vmatprep.subr.bf16.mxu0 %v3012_v40  ;;  %2747 = vmatpush3.bf16.msra.mxu1 %v3010_v41  ;;  %v3058_v40 = vld [vmem:[#allocation5 + $0x5e0] sm:$0xff]  }
  0xa6   :  { %2776 = vmatprep.subr.bf16.mxu1 %v3013_v44  ;;  %v3059_v41 = vld [vmem:[#allocation5 + $0x520] sm:$0xff]   ;;  %v3062_v44 = vld [vmem:[#allocation5 + $0x5d8] sm:$0xff]  }
  0xa7   :  { %2039 = vmatmul.mubr.bf16.vlgmr.msra.gmra.mxu0 %v211_v45  ;;  %v3063_v45 = vld [vmem:[#allocation5 + $0x518] sm:$0xff]  }
  0xa8   :  { %2755 = vmatpush3.bf16.msra.mxu0 %v3014_v46  ;;  %2079 = vmatmul.mubr.bf16.vlgmr.msra.gmra.mxu1 %v213_v50  ;;  %v3064_v46 = vld [vmem:[#allocation5 + $0x598] sm:$0xff]   ;;  %v3068_v50 = vld [vmem:[#allocation5 + $0x590] sm:$0xff]  }
  0xa9   :  { %2756 = vmatprep.subr.bf16.mxu0 %v3016_v51  ;;  %2777 = vmatpush3.bf16.msra.mxu1 %v3015_v49  ;;  %v3067_v49 = vld [vmem:[#allocation5 + $0x510] sm:$0xff]   ;;  %v3069_v51 = vld [vmem:[#allocation5 + $0x548] sm:$0xff]  }
  0xaa   :  { %2778 = vmatprep.subr.bf16.mxu1 %v3017_v53  ;;  %2118 = vmatprep.mubr.bf16.mxu0 %v216_v25  ;;  %v3071_v53 = vld [vmem:[#allocation5 + $0x508] sm:$0xff]  }
  0xab   :  { %2158 = vmatprep.mubr.bf16.mxu1 %v218_v30 }
  0xac   :  { %2757 = vmatpush3.bf16.msra.mxu0 %v3018_v54  ;;  %v3072_v54 = vld [vmem:[#allocation5 + $0x588] sm:$0xff]  }
  0xad   :  { %2758 = vmatprep.subr.bf16.mxu0 %v3020_v56  ;;  %2779 = vmatpush3.bf16.msra.mxu1 %v3019_v55  ;;  %v3073_v55 = vld [vmem:[#allocation5 + $0x540] sm:$0xff]  }
  0xae   :  { %2780 = vmatprep.subr.bf16.mxu1 %v3021_v57  ;;  %v3074_v56 = vld [vmem:[#allocation5 + $0x5c0] sm:$0xff]  }
  0xaf   :  { %v3075_v57 = vld [vmem:[#allocation5 + $0x500] sm:$0xff]  }
  0xb0   :  { %2759 = vmatpush3.bf16.msra.mxu0 %v3022_v58  ;;  %v66_v58 = vld [vmem:[#allocation2 + $0x28] sm:$0xff] }
  0xb1   :  { %2760 = vmatprep.subr.bf16.mxu0 %v3024_v60  ;;  %2781 = vmatpush3.bf16.msra.mxu1 %v3023_v59  ;;  %v3076_v59 = vld [vmem:[#allocation5 + $0x580] sm:$0xff]   ;;  %v165_v60 = vrot.slane %v66_v58, %v3220_v35 }
  0xb2   :  { %2782 = vmatprep.subr.bf16.mxu1 %v3025_v61  ;;  %v158_v61 = vcombine.high %v66_v58, %v66_v58 }
  0xb4   :  { %2761 = vmatpush3.bf16.msra.mxu0 %v3026_v62  ;;  %v173_v62 = vcombine.high %v165_v60, %v165_v60 }
  0xb5   :  { %2762 = vmatprep.subr.bf16.mxu0 %v3028_v0  ;;  %2783 = vmatpush3.bf16.msra.mxu1 %v3027_v63  ;;  %v172_v63 = vrot.slane %v158_v61, %v3220_v35  ;;  %v219_v0 = vpack.c.bf16 %v165_v60, %v165_v60 }
  0xb6   :  { %2784 = vmatprep.subr.bf16.mxu1 %v3029_v1  ;;  %v220_v1 = vpack.c.bf16 %v173_v62, %v173_v62 }
  0xb8   :  { %2763 = vmatpush3.bf16.msra.mxu0 %v3030_v2  ;;  %v174_v2 = vcombine.high %v172_v63, %v172_v63 }
  0xb9   :  { %2764 = vmatprep.subr.bf16.mxu0 %v3032_v4  ;;  %2785 = vmatpush3.bf16.msra.mxu1 %v3031_v3  ;;  %v221_v3 = vpack.c.bf16 %v172_v63, %v172_v63 }
  0xba   :  { %2786 = vmatprep.subr.bf16.mxu1 %v3033_v5  ;;  %v222_v4 = vpack.c.bf16 %v174_v2, %v174_v2 }
  0xbc   :  { %2765 = vmatpush3.bf16.msra.mxu0 %v3034_v6 }
  0xbd   :  { %2766 = vmatprep.subr.bf16.mxu0 %v3036_v8  ;;  %2787 = vmatpush3.bf16.msra.mxu1 %v3035_v7  ;;  %v2376_v7 = vld [vmem:[%s3245_s2] ss:$0 sm:$0xff] }
  0xbe   :  { %2788 = vmatprep.subr.bf16.mxu1 %v3037_v9 }
  0xc0   :  { %2767 = vmatpush3.bf16.msra.mxu0 %v3038_v10 }
  0xc1   :  { %2768 = vmatprep.subr.bf16.mxu0 %v3040_v12  ;;  %2789 = vmatpush3.bf16.msra.mxu1 %v3039_v11 }
  0xc2   :  { %2790 = vmatprep.subr.bf16.mxu1 %v3041_v13 }
  0xc4   :  { %2769 = vmatpush3.bf16.msra.mxu0 %v3042_v14 }
  0xc5   :  { %2798 = vmatprep.subr.bf16.mxu0 %v3045_v19  ;;  %2791 = vmatpush3.bf16.msra.mxu1 %v3043_v16  ;;  %v3079_v19 = vld [vmem:[#allocation7 + $0x30] sm:$0xff]  }
  0xc6   :  { %2820 = vmatprep.subr.bf16.mxu1 %v3046_v22  ;;  %v3082_v22 = vld [vmem:[#allocation7 + $0x18] sm:$0xff]  }
  0xc7   :  { %2119 = vmatmul.mubr.bf16.vlgmr.msra.gmra.mxu0 %v215_v23 }
  0xc8   :  { %2799 = vmatpush3.bf16.msra.mxu0 %v3047_v24  ;;  %2159 = vmatmul.mubr.bf16.vlgmr.msra.gmra.mxu1 %v217_v28 }
  0xc9   :  { %2800 = vmatprep.subr.bf16.mxu0 %v3049_v29  ;;  %2821 = vmatpush3.bf16.msra.mxu1 %v3048_v27  ;;  %v3083_v27 = vld [vmem:[#allocation7 + $0x10] sm:$0xff]  }
  0xca   :  { %2822 = vmatprep.subr.bf16.mxu1 %v3050_v31  ;;  %2198 = vmatprep.mubr.bf16.mxu0 %v220_v1 }
  0xcb   :  { %2238 = vmatprep.mubr.bf16.mxu1 %v222_v4 }
  0xcc   :  { %2801 = vmatpush3.bf16.msra.mxu0 %v3051_v32 }
  0xcd   :  { %2802 = vmatprep.subr.bf16.mxu0 %v3053_v34  ;;  %2823 = vmatpush3.bf16.msra.mxu1 %v3052_v33 }
  0xce   :  { %2824 = vmatprep.subr.bf16.mxu1 %v3054_v36  ;;  %v3084_v36 = vld [vmem:[#allocation7 + $0x8] sm:$0xff]  }
  0xd0   :  { %2803 = vmatpush3.bf16.msra.mxu0 %v3055_v37 }
  0xd1   :  { %2804 = vmatprep.subr.bf16.mxu0 %v3057_v39  ;;  %2825 = vmatpush3.bf16.msra.mxu1 %v3056_v38  ;;  %v3085_v38 = vld [vmem:[#allocation7] sm:$0xff]  }
  0xd2   :  { %2826 = vmatprep.subr.bf16.mxu1 %v3058_v40 }
  0xd4   :  { %2805 = vmatpush3.bf16.msra.mxu0 %v3059_v41 }
  0xd5   :  { %2806 = vmatprep.subr.bf16.mxu0 %v3061_v43  ;;  %2827 = vmatpush3.bf16.msra.mxu1 %v3060_v42 }
  0xd6   :  { %2828 = vmatprep.subr.bf16.mxu1 %v3062_v44 }
  0xd8   :  { %2807 = vmatpush3.bf16.msra.mxu0 %v3063_v45 }
  0xd9   :  { %2808 = vmatprep.subr.bf16.mxu0 %v3065_v47  ;;  %2829 = vmatpush3.bf16.msra.mxu1 %v3064_v46 }
  0xda   :  { %2830 = vmatprep.subr.bf16.mxu1 %v3066_v48 }
  0xdc   :  { %2809 = vmatpush3.bf16.msra.mxu0 %v3067_v49 }
  0xdd   :  { %2810 = vmatprep.subr.bf16.mxu0 %v3069_v51  ;;  %2831 = vmatpush3.bf16.msra.mxu1 %v3068_v50 }
  0xde   :  { %2832 = vmatprep.subr.bf16.mxu1 %v3070_v52 }
  0xe0   :  { %2811 = vmatpush3.bf16.msra.mxu0 %v3071_v53 }
  0xe1   :  { %2812 = vmatprep.subr.bf16.mxu0 %v3073_v55  ;;  %2833 = vmatpush3.bf16.msra.mxu1 %v3072_v54 }
  0xe2   :  { %2834 = vmatprep.subr.bf16.mxu1 %v3074_v56 }
  0xe4   :  { %2813 = vmatpush3.bf16.msra.mxu0 %v3075_v57 }
  0xe5   :  { %2835 = vmatpush3.bf16.msra.mxu1 %v3076_v59  ;;  %2851 = vmatprep.subr.bf16.mxu0 %v3178_v18 }
  0xe7   :  { %2199 = vmatmul.mubr.bf16.vlgmr.msra.gmra.mxu0 %v219_v0 }
  0xe8   :  { %2239 = vmatmul.mubr.bf16.vlgmr.msra.gmra.mxu1 %v221_v3  ;;  %2852 = vmatpush3.bf16.msra.mxu0 %v3078_v17 }
  0xe9   :  { %2853 = vmatprep.subr.bf16.mxu0 %v3178_v18  ;;  %2867 = vmatprep.mubr.msk.bf16.mxu0 %vm3179_vm0, %v3178_v18 }
  0xec   :  { %2854 = vmatpush3.bf16.msra.mxu0 %v3079_v19 }
  0xed   :  { %2855 = vmatprep.subr.bf16.mxu0 %v3178_v18 }
  0xf0   :  { %2856 = vmatpush3.bf16.msra.mxu0 %v3080_v20 }
  0xf1   :  { %2857 = vmatprep.subr.bf16.mxu0 %v3178_v18 }
  0xf4   :  { %2858 = vmatpush3.bf16.msra.mxu0 %v3081_v21 }
  0xf5   :  { %2859 = vmatprep.subr.bf16.mxu0 %v3178_v18 }
  0xf8   :  { %2860 = vmatpush3.bf16.msra.mxu0 %v3082_v22 }
  0xf9   :  { %2861 = vmatprep.subr.bf16.mxu0 %v3178_v18 }
  0xfc   :  { %2862 = vmatpush3.bf16.msra.mxu0 %v3083_v27 }
  0xfd   :  { %2863 = vmatprep.subr.bf16.mxu0 %v3178_v18 }
 0x100   :  { %2864 = vmatpush3.bf16.msra.mxu0 %v3084_v36 }
 0x101   :  { %2865 = vmatprep.subr.bf16.mxu0 %v3178_v18 }
 0x104   :  { %2866 = vmatpush3.bf16.msra.mxu0 %v3085_v38 }
 0x107   :  { %v2594_v5 = vpop.f32.mrf.mxu0 }
 0x108   :  { %v2616_v6 = vpop.f32.mrf.mxu1 }
 0x109   :  { %v2595_v8 = vpop.f32.mrf.mxu0 }
 0x10a   :  { %v2596_v35 = vadd.f32 %v2595_v8, %v2594_v5  ;;  %v2617_v9 = vpop.f32.mrf.mxu1 }
 0x10b   :  { %v2597_v10 = vpop.f32.mrf.mxu0  ;;  %v2618_v12 = vadd.f32 %v2617_v9, %v2616_v6 }
 0x10c   :  { %v1801_v11 = vadd.f32 %v2596_v35, %v2376_v7  ;;  %v2619_v13 = vpop.f32.mrf.mxu1 }
 0x10d   :  { %v2598_v14 = vpop.f32.mrf.mxu0 }
 0x10e   :  { %v1841_v15 = vadd.f32 %v2618_v12, %v1801_v11  ;;  %v2620_v16 = vpop.f32.mrf.mxu1 }
 0x127   :  { %v2638_v23 = vpop.f32.mrf.mxu0 }
 0x128   :  { %v2660_v24 = vpop.f32.mrf.mxu1 }
 0x129   :  { %v2639_v25 = vpop.f32.mrf.mxu0 }
 0x12a   :  { %v2640_v26 = vadd.f32 %v2639_v25, %v2638_v23  ;;  %v2661_v28 = vpop.f32.mrf.mxu1 }
 0x12b   :  { %v2641_v29 = vpop.f32.mrf.mxu0  ;;  %v2662_v31 = vadd.f32 %v2661_v28, %v2660_v24  ;;  %v2569_v24 = vld [vmem:[%s3247_s4] ss:$0 sm:$0xff] }
 0x12c   :  { %v1881_v30 = vadd.f32 %v2640_v26, %v1841_v15  ;;  %v2663_v32 = vpop.f32.mrf.mxu1 }
 0x12d   :  { %v2642_v33 = vpop.f32.mrf.mxu0 }
 0x12e   :  { %v1921_v34 = vadd.f32 %v2662_v31, %v1881_v30  ;;  %v2664_v37 = vpop.f32.mrf.mxu1 }
 0x147   :  { %v2682_v39 = vpop.f32.mrf.mxu0 }
 0x148   :  { %v2704_v40 = vpop.f32.mrf.mxu1 }
 0x149   :  { %v2683_v41 = vpop.f32.mrf.mxu0 }
 0x14a   :  { %v2684_v42 = vadd.f32 %v2683_v41, %v2682_v39  ;;  %v2705_v43 = vpop.f32.mrf.mxu1 }
 0x14b   :  { %v2685_v44 = vpop.f32.mrf.mxu0  ;;  %v2706_v46 = vadd.f32 %v2705_v43, %v2704_v40 }
 0x14c   :  { %v1961_v45 = vadd.f32 %v2684_v42, %v1921_v34  ;;  %v2707_v47 = vpop.f32.mrf.mxu1 }
 0x14d   :  { %v2686_v48 = vpop.f32.mrf.mxu0 }
 0x14e   :  { %v2001_v49 = vadd.f32 %v2706_v46, %v1961_v45  ;;  %v2708_v50 = vpop.f32.mrf.mxu1 }
 0x167   :  { %v2726_v51 = vpop.f32.mrf.mxu0 }
 0x168   :  { %v2748_v52 = vpop.f32.mrf.mxu1 }
 0x169   :  { %v2727_v53 = vpop.f32.mrf.mxu0 }
 0x16a   :  { %v2749_v54 = vpop.f32.mrf.mxu1  ;;  %v2728_v3 = vadd.f32 %v2727_v53, %v2726_v51 }
 0x16b   :  { %v2729_v55 = vpop.f32.mrf.mxu0  ;;  %v2750_v5 = vadd.f32 %v2749_v54, %v2748_v52 }
 0x16c   :  { %v2751_v56 = vpop.f32.mrf.mxu1  ;;  %v2041_v4 = vadd.f32 %v2728_v3, %v2001_v49 }
 0x16d   :  { %v2730_v57 = vpop.f32.mrf.mxu0 }
 0x16e   :  { %v2752_v58 = vpop.f32.mrf.mxu1  ;;  %v2081_v7 = vadd.f32 %v2750_v5, %v2041_v4 }
 0x187   :  { %v2770_v59 = vpop.f32.mrf.mxu0 }
 0x188   :  { %v2792_v60 = vpop.f32.mrf.mxu1 }
 0x189   :  { %v2771_v61 = vpop.f32.mrf.mxu0 }
 0x18a   :  { %v2793_v62 = vpop.f32.mrf.mxu1  ;;  %v2772_v6 = vadd.f32 %v2771_v61, %v2770_v59 }
 0x18b   :  { %v2773_v63 = vpop.f32.mrf.mxu0  ;;  %v2794_v35 = vadd.f32 %v2793_v62, %v2792_v60 }
 0x18c   :  { %v2795_v0 = vpop.f32.mrf.mxu1  ;;  %v2121_v8 = vadd.f32 %v2772_v6, %v2081_v7 }
 0x18d   :  { %v2774_v1 = vpop.f32.mrf.mxu0 }
 0x18e   :  { %v2796_v2 = vpop.f32.mrf.mxu1  ;;  %v2161_v12 = vadd.f32 %v2794_v35, %v2121_v8 }
 0x1a7   :  { %v2814_v9 = vpop.f32.mrf.mxu0 }
 0x1a8   :  { %v2836_v10 = vpop.f32.mrf.mxu1 }
 0x1a9   :  { %v2815_v11 = vpop.f32.mrf.mxu0 }
 0x1aa   :  { %v2816_v13 = vadd.f32 %v2815_v11, %v2814_v9  ;;  %v2837_v14 = vpop.f32.mrf.mxu1 }
 0x1ab   :  { %v2817_v15 = vpop.f32.mrf.mxu0  ;;  %v2838_v17 = vadd.f32 %v2837_v14, %v2836_v10 }
 0x1ac   :  { %v2201_v16 = vadd.f32 %v2816_v13, %v2161_v12  ;;  %v2839_v18 = vpop.f32.mrf.mxu1 }
 0x1ad   :  { %v2818_v19 = vpop.f32.mrf.mxu0 }
 0x1ae   :  { %v2241_v20 = vadd.f32 %v2838_v17, %v2201_v16  ;;  %v2840_v21 = vpop.f32.mrf.mxu1 }
 0x1b0   :  { %v2246_v22 = vmax.f32 %v2241_v20, 0.0 }
 0x1b2   :  { %v2247_v23 = vpack.c.bf16 %v2246_v22, %v2246_v22 }
 0x1b4   :  { %2868 = vmatmul.mubr.bf16.vlgmr.msra.gmra.mxu0 %v2247_v23 }
 0x274   :  { %v2353_v25 = vpop.f32.mrf.mxu0 }
 0x275   :  { %v2354_v26 = vadd.f32 %v2569_v24, %v2353_v25 }
 0x276   :  { %v2869_v27 = vpop.f32.mrf.mxu0 }
 0x277   :  { %2359 = vst [vmem:[#allocation8] sm:$0x3] %v2354_v26 }
 0x278   :  { %v2356_v28 = vpop.f32.mrf.mxu0 }
 0x279   :  { %3157 = shalt.err (!%p3154_p5)
}
 0x27a   :  { %2369 = dma.vmem_to_hbm [thread:$0]  %s2367_s11, 32, %s3248_s5, [#allocation4]   ;;  %v2870_v29 = vpop.f32.mrf.mxu0 }
 0x27b   :  { %3170 = dma.done.wait [#allocation4], 32  }
 0x27c   :  { %3171 = vsyncadd [#allocation4], 4294967264 }
 0x27d   :  { %2373 = vsyncpa [#allocation3], 1 }
 0x27e   :  { %2374 = vsyncpa [#allocation6], 1 }
 0x27f   :  { %2375 = vsyncpa [#allocation4], 1 }

</bundles_post_ra>
